<compile_context>
chip_gen: v6e
topology: v6e:2x2x1
jax: 0.10.0
libtpu: 0.0.40
codegen_flags: <defaults>
</compile_context>

<pallas_src>
import functools

import jax
import jax.numpy as jnp
from jax.experimental import pallas as pl
from jax.experimental.pallas import tpu as pltpu

LANE = 128


def _round_up(x, m):
    return ((x + m - 1) // m) * m


def _pad2d(x, rows, cols):
    return jnp.pad(x, ((0, rows - x.shape[0]), (0, cols - x.shape[1])))


def _sage_layer_kernel(*refs, project_first: bool, relu_dropout: bool,
                       keep_prob: float):
    if relu_dropout:
        (a_ref, hsrc_ref, hdst_ref, ws_ref, wn_ref, b_ref, u_ref,
         out_ref, acc_ref) = refs
    else:
        (a_ref, hsrc_ref, hdst_ref, ws_ref, wn_ref, b_ref,
         out_ref, acc_ref) = refs
        u_ref = None

    k = pl.program_id(1)

    @pl.when(k == 0)
    def _init():
        acc_ref[...] = jnp.zeros_like(acc_ref)

    a = a_ref[...]                      # [tm, tk] bf16
    h = hsrc_ref[...]                   # [tk, F_in_p] f32

    if project_first:
        # Contract the big A matmul over F_out (< F_in): A @ (H @ W_neigh)
        hp = jnp.dot(h, wn_ref[...], preferred_element_type=jnp.float32)
        acc_ref[...] += jnp.dot(a, hp.astype(jnp.bfloat16),
                                preferred_element_type=jnp.float32)
    else:
        # Accumulate A @ H; project with W_neigh once at the end.
        acc_ref[...] += jnp.dot(a, h.astype(jnp.bfloat16),
                                preferred_element_type=jnp.float32)

    @pl.when(k == pl.num_programs(1) - 1)
    def _finalize():
        neigh = acc_ref[...]
        if not project_first:
            neigh = jnp.dot(neigh, wn_ref[...],
                            preferred_element_type=jnp.float32)
        out = (jnp.dot(hdst_ref[...], ws_ref[...],
                       preferred_element_type=jnp.float32)
               + neigh + b_ref[...])
        if relu_dropout:
            out = jnp.maximum(out, 0.0)
            # Inverted dropout with precomputed uniforms (keep if u < keep_prob).
            # NOTE: on real TPU this could use pltpu.prng_random_bits to avoid the
            # extra HBM stream, but that primitive has no CPU-interpret lowering.
            keep = u_ref[...] < keep_prob
            out = jnp.where(keep, out * (1.0 / keep_prob), 0.0)
        out_ref[...] = out.astype(out_ref.dtype)


def sage_conv_layer(a_bf16, h, w_self, w_neigh, bias, dropout_u, *,
                    relu_dropout: bool, keep_prob: float, tm: int, tk: int):
    """One fused SAGEConv('mean') [+ ReLU + Dropout] layer, tiled over (dst, src)."""
    n_pad = a_bf16.shape[0]
    f_in_p = h.shape[1]
    f_out_p = w_self.shape[1]
    project_first = f_out_p < f_in_p
    acc_cols = f_out_p if project_first else f_in_p
    grid = (n_pad // tm, n_pad // tk)

    kernel = functools.partial(
        _sage_layer_kernel,
        project_first=project_first,
        relu_dropout=relu_dropout,
        keep_prob=keep_prob,
    )

    in_specs = [
        pl.BlockSpec((tm, tk), lambda i, k: (i, k)),            # A tile (bf16)
        pl.BlockSpec((tk, f_in_p), lambda i, k: (k, 0)),        # H (src rows)
        pl.BlockSpec((tm, f_in_p), lambda i, k: (i, 0)),        # H (dst rows)
        pl.BlockSpec((f_in_p, f_out_p), lambda i, k: (0, 0)),   # W_self
        pl.BlockSpec((f_in_p, f_out_p), lambda i, k: (0, 0)),   # W_neigh
        pl.BlockSpec((1, f_out_p), lambda i, k: (0, 0)),        # bias
    ]
    args = [a_bf16, h, h, w_self, w_neigh, bias]
    if relu_dropout:
        in_specs.append(pl.BlockSpec((tm, f_out_p), lambda i, k: (i, 0)))
        args.append(dropout_u)

    return pl.pallas_call(
        kernel,
        out_shape=jax.ShapeDtypeStruct((n_pad, f_out_p), jnp.float32),
        grid=grid,
        in_specs=in_specs,
        out_specs=pl.BlockSpec((tm, f_out_p), lambda i, k: (i, 0)),
        scratch_shapes=[pltpu.VMEM((tm, acc_cols), jnp.float32)],
        compiler_params=pltpu.CompilerParams(
            dimension_semantics=("parallel", "arbitrary")),
    )(*args)


def init_sage_params(key, in_feats, n_hidden, n_classes):
    dims = [(in_feats, n_hidden), (n_hidden, n_hidden), (n_hidden, n_classes)]
    params = []
    for i, (fi, fo) in enumerate(dims):
        k1, k2, key = jax.random.split(jax.random.fold_in(key, i), 3)
        scale = 1.0 / jnp.sqrt(jnp.float32(fi))
        w_self = jax.random.uniform(k1, (fi, fo), jnp.float32, -scale, scale)
        w_neigh = jax.random.uniform(k2, (fi, fo), jnp.float32, -scale, scale)
        bias = jnp.zeros((1, fo), jnp.float32)
        params.append((w_self, w_neigh, bias))
    return params


def sage_forward(blocks, x, params, dropout_key, dropout_rate=0.5, tile=256):
    """blocks: list of dense row-normalized adjacency matrices [N, N]."""
    assert 0.0 <= dropout_rate < 1.0
    n = x.shape[0]
    n_layers = len(params)
    keep_prob = 1.0 - dropout_rate

    # Pad node dim to a lane/tile-friendly size; pick tiles that divide it.
    n_pad = _round_up(max(n, 8), LANE)
    tm = min(tile, n_pad)
    tk = min(tile, n_pad)
    n_pad = _round_up(n_pad, max(tm, tk))

    h = _pad2d(x.astype(jnp.float32), n_pad, _round_up(x.shape[1], LANE))

    for l, (a_mean, (w_self, w_neigh, bias)) in enumerate(zip(blocks, params)):
        f_in, f_out = w_self.shape
        f_in_p = _round_up(f_in, LANE)
        f_out_p = _round_up(f_out, LANE)

        a_p = _pad2d(a_mean, n_pad, n_pad).astype(jnp.bfloat16)
        ws_p = _pad2d(w_self, f_in_p, f_out_p)
        wn_p = _pad2d(w_neigh, f_in_p, f_out_p)
        b_p = _pad2d(bias.reshape(1, -1), 1, f_out_p)

        relu_dropout = (l != n_layers - 1)
        dropout_u = None
        if relu_dropout:
            dropout_key, sub = jax.random.split(dropout_key)
            dropout_u = jax.random.uniform(sub, (n_pad, f_out_p), jnp.float32)

        h = sage_conv_layer(
            a_p, h, ws_p, wn_p, b_p, dropout_u,
            relu_dropout=relu_dropout,
            keep_prob=keep_prob,
            tm=tm, tk=tk,
        )

    n_classes = params[-1][0].shape[1]
    return h[:n, :n_classes]


def _ref_forward_no_dropout(blocks, x, params):
    """Pure-JAX reference (A in bf16 to match the kernel's A stream), no dropout."""
    h = x.astype(jnp.float32)
    n_layers = len(params)
    for l, (a, (ws, wn, b)) in enumerate(zip(blocks, params)):
        a32 = a.astype(jnp.bfloat16).astype(jnp.float32)
        hn = jnp.dot(a32, h.astype(jnp.bfloat16).astype(jnp.float32))
        h_new = h @ ws + hn @ wn + b
        if l != n_layers - 1:
            h_new = jnp.maximum(h_new, 0.0)
        h = h_new
    return h


if __name__ == "__main__":
    key = jax.random.PRNGKey(0)

    N = 16          # number of graph nodes (N_src == N_dst for every block)
    in_feats = 8
    n_hidden = 32
    n_classes = 4

    k_adj, k_x, k_p, k_drop = jax.random.split(key, 4)

    # Dense random adjacency -> row-normalized mean aggregation matrix.
    adj = (jax.random.uniform(k_adj, (N, N)) < 0.3).astype(jnp.float32)
    deg = jnp.clip(adj.sum(axis=1, keepdims=True), 1.0, None)
    a_mean = adj / deg
    blocks = [a_mean, a_mean, a_mean]   # same graph re-used for all 3 layers

    x = jax.random.normal(k_x, (N, in_feats), jnp.float32)
    params = init_sage_params(k_p, in_feats, n_hidden, n_classes)

    # Correctness sanity check: with dropout_rate=0 the kernel must match pure JAX.
    out_nodrop = sage_forward(blocks, x, params, k_drop, dropout_rate=0.0)
    out_nodrop = jax.block_until_ready(out_nodrop)
    ref = _ref_forward_no_dropout(blocks, x, params)
    assert out_nodrop.shape == (N, n_classes), out_nodrop.shape
    assert jnp.allclose(out_nodrop, ref, atol=5e-3, rtol=5e-3), (
        float(jnp.max(jnp.abs(out_nodrop - ref))))

    # Forward pass matching the module (training-mode dropout p=0.5).
    out = sage_forward(blocks, x, params, k_drop, dropout_rate=0.5)
    out = jax.block_until_ready(out)

    assert out.shape == (N, n_classes), out.shape
    assert bool(jnp.all(jnp.isfinite(out)))
    print("KERNEL_OK")
</pallas_src>

<mosaic_0001>
module attributes {stable_mosaic.version = 11 : i64} {
  func.func @_sage_layer_kernel(%arg0: i32, %arg1: i32, %arg2: memref<128x128xbf16, #tpu.memory_space<vmem>>, %arg3: memref<128x128xf32, #tpu.memory_space<vmem>>, %arg4: memref<128x128xf32, #tpu.memory_space<vmem>>, %arg5: memref<128x128xf32, #tpu.memory_space<vmem>>, %arg6: memref<128x128xf32, #tpu.memory_space<vmem>>, %arg7: memref<1x128xf32, #tpu.memory_space<vmem>>, %arg8: memref<128x128xf32, #tpu.memory_space<vmem>>, %arg9: memref<128x128xf32, #tpu.memory_space<vmem>>, %arg10: memref<128x128xf32, #tpu.memory_space<vmem>>) attributes {dimension_semantics = [#tpu.dimension_semantics<parallel>, #tpu.dimension_semantics<arbitrary>], iteration_bounds = array<i64: 1, 1>, scalar_prefetch = 0 : i64, scratch_operands = 1 : i64, tpu.core_type = #tpu.core_type<tc>, window_params = [{transform_indices = @transform_0, window_bounds = array<i64: 128, 128>}, {transform_indices = @transform_1, window_bounds = array<i64: 128, 128>}, {transform_indices = @transform_2, window_bounds = array<i64: 128, 128>}, {pipeline_mode = #tpu.pipeline_mode<synchronous>, transform_indices = @transform_3, window_bounds = array<i64: 128, 128>}, {pipeline_mode = #tpu.pipeline_mode<synchronous>, transform_indices = @transform_4, window_bounds = array<i64: 128, 128>}, {pipeline_mode = #tpu.pipeline_mode<synchronous>, transform_indices = @transform_5, window_bounds = array<i64: 1, 128>}, {transform_indices = @transform_6, window_bounds = array<i64: 128, 128>}, {transform_indices = @transform_7, window_bounds = array<i64: 128, 128>}]} {
    %c0_i32 = arith.constant 0 : i32
    %0 = arith.cmpi eq, %arg1, %c0_i32 : i32
    %1 = arith.extui %0 : i1 to i32
    %c0_i32_0 = arith.constant 0 : i32
    %2 = arith.cmpi ne, %1, %c0_i32_0 : i32
    scf.if %2 {
      %cst_10 = arith.constant 0.000000e+00 : f32
      %13 = vector.broadcast %cst_10 : f32 to vector<128x128xf32>
      %c0_11 = arith.constant 0 : index
      %c0_12 = arith.constant 0 : index
      %14 = vector.load %arg10[%c0_11, %c0_12] : memref<128x128xf32, #tpu.memory_space<vmem>>, vector<128x128xf32>
      tpu.vector_store %arg10[%c0_11, %c0_12], %13 {strides = array<i32>} : memref<128x128xf32, #tpu.memory_space<vmem>>, vector<128x128xf32>,
    } else {
    }
    %c0 = arith.constant 0 : index
    %c0_1 = arith.constant 0 : index
    %3 = vector.load %arg2[%c0, %c0_1] : memref<128x128xbf16, #tpu.memory_space<vmem>>, vector<128x128xbf16>
    %c0_2 = arith.constant 0 : index
    %c0_3 = arith.constant 0 : index
    %4 = vector.load %arg3[%c0_2, %c0_3] : memref<128x128xf32, #tpu.memory_space<vmem>>, vector<128x128xf32>
    %c0_4 = arith.constant 0 : index
    %c0_5 = arith.constant 0 : index
    %5 = vector.load %arg10[%c0_4, %c0_5] : memref<128x128xf32, #tpu.memory_space<vmem>>, vector<128x128xf32>
    %6 = arith.truncf %4 : vector<128x128xf32> to vector<128x128xbf16>
    %cst = arith.constant dense<0.000000e+00> : vector<128x128xf32>
    %7 = tpu.matmul %3, %6, %cst {dimension_numbers = #tpu.dot_dimension_numbers<[1], [0], [0], [1], [0, 0, 1, 1], [], []>} : vector<128x128xbf16>, vector<128x128xbf16>, vector<128x128xf32> -> vector<128x128xf32>
    %8 = arith.addf %5, %7 : vector<128x128xf32>
    %c0_6 = arith.constant 0 : index
    %c0_7 = arith.constant 0 : index
    %9 = vector.load %arg10[%c0_6, %c0_7] : memref<128x128xf32, #tpu.memory_space<vmem>>, vector<128x128xf32>
    tpu.vector_store %arg10[%c0_6, %c0_7], %8 {strides = array<i32>} : memref<128x128xf32, #tpu.memory_space<vmem>>, vector<128x128xf32>,
    %c0_i32_8 = arith.constant 0 : i32
    %10 = arith.cmpi eq, %arg1, %c0_i32_8 : i32
    %11 = arith.extui %10 : i1 to i32
    %c0_i32_9 = arith.constant 0 : i32
    %12 = arith.cmpi ne, %11, %c0_i32_9 : i32
    scf.if %12 {
      %c0_10 = arith.constant 0 : index
      %c0_11 = arith.constant 0 : index
      %13 = vector.load %arg10[%c0_10, %c0_11] : memref<128x128xf32, #tpu.memory_space<vmem>>, vector<128x128xf32>
      %c0_12 = arith.constant 0 : index
      %c0_13 = arith.constant 0 : index
      %14 = vector.load %arg6[%c0_12, %c0_13] : memref<128x128xf32, #tpu.memory_space<vmem>>, vector<128x128xf32>
      %cst_14 = arith.constant dense<0.000000e+00> : vector<128x128xf32>
      %15 = tpu.matmul %13, %14, %cst_14 {dimension_numbers = #tpu.dot_dimension_numbers<[1], [0], [0], [1], [0, 0, 1, 1], [], []>} : vector<128x128xf32>, vector<128x128xf32>, vector<128x128xf32> -> vector<128x128xf32>
      %c0_15 = arith.constant 0 : index
      %c0_16 = arith.constant 0 : index
      %16 = vector.load %arg4[%c0_15, %c0_16] : memref<128x128xf32, #tpu.memory_space<vmem>>, vector<128x128xf32>
      %c0_17 = arith.constant 0 : index
      %c0_18 = arith.constant 0 : index
      %17 = vector.load %arg5[%c0_17, %c0_18] : memref<128x128xf32, #tpu.memory_space<vmem>>, vector<128x128xf32>
      %cst_19 = arith.constant dense<0.000000e+00> : vector<128x128xf32>
      %18 = tpu.matmul %16, %17, %cst_19 {dimension_numbers = #tpu.dot_dimension_numbers<[1], [0], [0], [1], [0, 0, 1, 1], [], []>} : vector<128x128xf32>, vector<128x128xf32>, vector<128x128xf32> -> vector<128x128xf32>
      %19 = arith.addf %18, %15 : vector<128x128xf32>
      %c0_20 = arith.constant 0 : index
      %c0_21 = arith.constant 0 : index
      %20 = vector.load %arg7[%c0_20, %c0_21] : memref<1x128xf32, #tpu.memory_space<vmem>>, vector<1x128xf32>
      %21 = vector.broadcast %20 : vector<1x128xf32> to vector<128x128xf32>
      %22 = arith.addf %19, %21 : vector<128x128xf32>
      %cst_22 = arith.constant 0.000000e+00 : f32
      %23 = vector.broadcast %cst_22 : f32 to vector<128x128xf32>
      %24 = arith.maximumf %22, %23 : vector<128x128xf32>
      %c0_23 = arith.constant 0 : index
      %c0_24 = arith.constant 0 : index
      %25 = vector.load %arg8[%c0_23, %c0_24] : memref<128x128xf32, #tpu.memory_space<vmem>>, vector<128x128xf32>
      %cst_25 = arith.constant 1.000000e+00 : f32
      %26 = vector.broadcast %cst_25 : f32 to vector<128x128xf32>
      %27 = arith.cmpf olt, %25, %26 : vector<128x128xf32>
      %cst_26 = arith.constant 1.000000e+00 : f32
      %28 = vector.broadcast %cst_26 : f32 to vector<128x128xf32>
      %29 = arith.mulf %24, %28 : vector<128x128xf32>
      %cst_27 = arith.constant 0.000000e+00 : f32
      %30 = vector.broadcast %cst_27 : f32 to vector<128x128xf32>
      %31 = arith.select %27, %29, %30 : vector<128x128xi1>, vector<128x128xf32>
      %c0_28 = arith.constant 0 : index
      %c0_29 = arith.constant 0 : index
      %32 = vector.load %arg9[%c0_28, %c0_29] : memref<128x128xf32, #tpu.memory_space<vmem>>, vector<128x128xf32>
      tpu.vector_store %arg9[%c0_28, %c0_29], %31 {strides = array<i32>} : memref<128x128xf32, #tpu.memory_space<vmem>>, vector<128x128xf32>,
    } else {
    }
    return
  }
  func.func @transform_0(%arg0: i32, %arg1: i32) -> (i32, i32) {
    %c0_i32 = arith.constant 0 : i32
    return %arg0, %arg1 : i32, i32
  }
  func.func @transform_1(%arg0: i32, %arg1: i32) -> (i32, i32) {
    %c0_i32 = arith.constant 0 : i32
    %c0_i32_0 = arith.constant 0 : i32
    return %arg1, %c0_i32 : i32, i32
  }
  func.func @transform_2(%arg0: i32, %arg1: i32) -> (i32, i32) {
    %c0_i32 = arith.constant 0 : i32
    %c0_i32_0 = arith.constant 0 : i32
    return %arg0, %c0_i32 : i32, i32
  }
  func.func @transform_3(%arg0: i32, %arg1: i32) -> (i32, i32) {
    %c0_i32 = arith.constant 0 : i32
    %c0_i32_0 = arith.constant 0 : i32
    %c0_i32_1 = arith.constant 0 : i32
    return %c0_i32, %c0_i32_0 : i32, i32
  }
  func.func @transform_4(%arg0: i32, %arg1: i32) -> (i32, i32) {
    %c0_i32 = arith.constant 0 : i32
    %c0_i32_0 = arith.constant 0 : i32
    %c0_i32_1 = arith.constant 0 : i32
    return %c0_i32, %c0_i32_0 : i32, i32
  }
  func.func @transform_5(%arg0: i32, %arg1: i32) -> (i32, i32) {
    %c0_i32 = arith.constant 0 : i32
    %c0_i32_0 = arith.constant 0 : i32
    %c0_i32_1 = arith.constant 0 : i32
    return %c0_i32, %c0_i32_0 : i32, i32
  }
  func.func @transform_6(%arg0: i32, %arg1: i32) -> (i32, i32) {
    %c0_i32 = arith.constant 0 : i32
    %c0_i32_0 = arith.constant 0 : i32
    return %arg0, %c0_i32 : i32, i32
  }
  func.func @transform_7(%arg0: i32, %arg1: i32) -> (i32, i32) {
    %c0_i32 = arith.constant 0 : i32
    %c0_i32_0 = arith.constant 0 : i32
    return %arg0, %c0_i32 : i32, i32
  }
}

</mosaic_0001>

<bundles_post_ra>
// kernel: tpu_custom_call.1
= control target key start
LH: loop header
LB: loop body
LE: loop exit
PB: predicated region body
PF: predicated region fallthrough
CT: control target
= control target key end

     0   :  { %12 = vsyncpa [#allocation4], 0  ;;  %s1484_s0 = inlined_call_operand.hbm [shape: bf16[128,128], index: 0, kind: input, shape index: {}]   ;;  %s1485_s1 = inlined_call_operand.hbm [shape: f32[128,128], index: 1, kind: input, shape index: {}]   ;;  %s1486_s2 = inlined_call_operand.hbm [shape: f32[128,128], index: 2, kind: input, shape index: {}]   ;;  %s1487_s3 = inlined_call_operand.hbm [shape: f32[128,128], index: 3, kind: input, shape index: {}]   ;;  %s1488_s4 = inlined_call_operand.hbm [shape: f32[128,128], index: 4, kind: input, shape index: {}]   ;;  %s1489_s5 = inlined_call_operand.vmem [shape: f32[1,128], index: 5, kind: input, shape index: {}]   ;;  %s1490_s6 = inlined_call_operand.hbm [shape: f32[128,128], index: 6, kind: input, shape index: {}]   ;;  %s1491_s7 = inlined_call_operand.hbm [shape: f32[128,128], index: 7, kind: output, shape index: {}]  }
   0x1   :  { %13 = vsyncpa [#allocation7], 0 }
   0x2   :  { %14 = vsyncpa [#allocation10], 0 }
   0x3   :  { %15 = vsyncpa [#allocation13], 0 }
   0x4   :  { %16 = vsyncpa [#allocation5], 0  ;;  %s1277_s24 = smov [#allocation6]  }
   0x5   :  { %s34_s25 = sshll.u32 %s1277_s24, 4  ;;  %s35_s25 = int_to_ptr.vmem [resolvable:$true] %s34_s25 }
   0x6   :  { %s1135_s26 = scalar_lea.vmem %s35_s25, 2048  ;;  %p1140_p1 = scmp.lt.s32.totalorder %s35_s25, %s35_s25 }
   0x7   :  { %p1136_p0 = scmp.ne.s32.totalorder %s35_s25, %s1135_s26  ;;  %p1141_p2 = scmp.lt.s32.totalorder %s1135_s26, %s1135_s26 }
   0x9   :  { %p1142_p3 = por %p1141_p2, %p1140_p1 }
   0xb   :  { %p1143_p4 = pnand %p1142_p3, %p1136_p0 }
   0xd   :  { %1146 = shalt.err (!%p1143_p4)
}
   0xe   :  { %s1278_s27 = smov 128   ;;  %s1279_s28 = smov 8  }
   0xf   :  { %40 = dma.hbm_to_vmem [thread:$0]  %s1485_s1, 2048, %s35_s25, [#allocation7], %s1278_s27, %s1278_s27, %s1279_s28  }
  0x10   :  { %s1280_s8 = smov [#allocation9]   ;;  %s1281_s10 = smov [#allocation3]  }
  0x11   :  { %s58_s9 = sshll.u32 %s1280_s8, 4  ;;  %s22_s11 = sshll.u32 %s1281_s10, 4  ;;  %s59_s9 = int_to_ptr.vmem [resolvable:$true] %s58_s9  ;;  %s23_s11 = int_to_ptr.vmem [resolvable:$true] %s22_s11 }
  0x12   :  { %s1155_s12 = scalar_lea.vmem %s59_s9, 2048  ;;  %p1160_p6 = scmp.lt.s32.totalorder %s59_s9, %s59_s9 }
  0x13   :  { %p1156_p5 = scmp.ne.s32.totalorder %s59_s9, %s1155_s12  ;;  %p1161_p7 = scmp.lt.s32.totalorder %s1155_s12, %s1155_s12 }
  0x15   :  { %p1162_p8 = por %p1161_p7, %p1160_p6 }
  0x17   :  { %p1163_p9 = pnand %p1162_p8, %p1156_p5 }
  0x19   :  { %1166 = shalt.err (!%p1163_p9)
}
  0x1a   :  { %64 = dma.hbm_to_vmem [thread:$0]  %s1487_s3, 2048, %s59_s9, [#allocation10], %s1278_s27, %s1278_s27, %s1279_s28  }
  0x1b   :  { %s1175_s1 = scalar_lea.vmem %s23_s11, 1024  ;;  %p1180_p11 = scmp.lt.s32.totalorder %s23_s11, %s23_s11 }
  0x1c   :  { %p1176_p10 = scmp.ne.s32.totalorder %s23_s11, %s1175_s1  ;;  %p1181_p12 = scmp.lt.s32.totalorder %s1175_s1, %s1175_s1 }
  0x1e   :  { %p1182_p13 = por %p1181_p12, %p1180_p11 }
  0x20   :  { %p1183_p0 = pnand %p1182_p13, %p1176_p10 }
  0x22   :  { %1186 = shalt.err (!%p1183_p0)
}
  0x23   :  { %s1282_s15 = smov 64   ;;  %s1283_s16 = smov 4  }
  0x24   :  { %28 = dma.hbm_to_vmem [thread:$0]  %s1484_s0, 1024, %s23_s11, [#allocation4], %s1282_s15, %s1282_s15, %s1283_s16  }
  0x25   :  { %s1284_s19 = smov [#allocation8]   ;;  %s1285_s21 = smov [#allocation11]  }
  0x26   :  { %s46_s20 = sshll.u32 %s1284_s19, 4  ;;  %s70_s22 = sshll.u32 %s1285_s21, 4  ;;  %s47_s20 = int_to_ptr.vmem [resolvable:$true] %s46_s20  ;;  %s71_s22 = int_to_ptr.vmem [resolvable:$true] %s70_s22 }
  0x27   :  { %s1195_s3 = scalar_lea.vmem %s47_s20, 2048  ;;  %p1200_p2 = scmp.lt.s32.totalorder %s47_s20, %s47_s20 }
  0x28   :  { %p1196_p1 = scmp.ne.s32.totalorder %s47_s20, %s1195_s3  ;;  %p1201_p3 = scmp.lt.s32.totalorder %s1195_s3, %s1195_s3 }
  0x2a   :  { %p1202_p4 = por %p1201_p3, %p1200_p2 }
  0x2c   :  { %p1203_p5 = pnand %p1202_p4, %p1196_p1 }
  0x2e   :  { %1206 = shalt.err (!%p1203_p5)
}
  0x2f   :  { %52 = dma.hbm_to_vmem [thread:$0]  %s1486_s2, 2048, %s47_s20, [#allocation7], %s1278_s27, %s1278_s27, %s1279_s28  }
  0x30   :  { %s1215_s0 = scalar_lea.vmem %s71_s22, 2048  ;;  %p1220_p7 = scmp.lt.s32.totalorder %s71_s22, %s71_s22 }
  0x31   :  { %p1216_p6 = scmp.ne.s32.totalorder %s71_s22, %s1215_s0  ;;  %p1221_p8 = scmp.lt.s32.totalorder %s1215_s0, %s1215_s0 }
  0x33   :  { %p1222_p9 = por %p1221_p8, %p1220_p7 }
  0x35   :  { %p1223_p10 = pnand %p1222_p9, %p1216_p6 }
  0x37   :  { %1226 = shalt.err (!%p1223_p10)
}
  0x38   :  { %76 = dma.hbm_to_vmem [thread:$0]  %s1488_s4, 2048, %s71_s22, [#allocation10], %s1278_s27, %s1278_s27, %s1279_s28  }
  0x39   :  { %s1286_s29 = smov [#allocation12]  }
  0x3a   :  { %s84_s30 = sshll.u32 %s1286_s29, 4  ;;  %s85_s30 = int_to_ptr.vmem [resolvable:$true] %s84_s30 }
  0x3b   :  { %s1235_s8 = scalar_lea.vmem %s85_s30, 2048  ;;  %p1240_p12 = scmp.lt.s32.totalorder %s85_s30, %s85_s30 }
  0x3c   :  { %p1236_p11 = scmp.ne.s32.totalorder %s85_s30, %s1235_s8  ;;  %p1241_p13 = scmp.lt.s32.totalorder %s1235_s8, %s1235_s8 }
  0x3e   :  { %p1242_p0 = por %p1241_p13, %p1240_p12 }
  0x40   :  { %p1243_p1 = pnand %p1242_p0, %p1236_p11 }
  0x42   :  { %1246 = shalt.err (!%p1243_p1)
}
  0x43   :  { %90 = dma.hbm_to_vmem [thread:$0]  %s1490_s6, 2048, %s85_s30, [#allocation13], %s1278_s27, %s1278_s27, %s1279_s28  }
  0x44   :  { %1267 = dma.done.wait [#allocation4], 1024  }
  0x45   :  { %1268 = vsyncadd [#allocation4], 4294966272 }
  0x46   :  { %1269 = dma.done.wait [#allocation7], 4096  }
  0x47   :  { %1270 = vsyncadd [#allocation7], 4294963200 }
  0x48   :  { %1271 = dma.done.wait [#allocation10], 4096  }
  0x49   :  { %1272 = vsyncadd [#allocation10], 4294963200 }
  0x4a   :  { %1273 = dma.done.wait [#allocation13], 2048  }
  0x4b   :  { %1274 = vsyncadd [#allocation13], 4294965248  ;;  %v160_v0 = vld [vmem:[#allocation6 + $0x70] sm:$0xff]  ;;  %v161_v1 = vld [vmem:[#allocation6 + $0x78] sm:$0xff] }
  0x4c   :  { %v158_v2 = vld [vmem:[#allocation6 + $0x60] sm:$0xff]  ;;  %v185_v3 = vpack.c.bf16 %v161_v1, %v160_v0  ;;  %v159_v4 = vld [vmem:[#allocation6 + $0x68] sm:$0xff]  ;;  %v156_v6 = vld [vmem:[#allocation6 + $0x50] sm:$0xff] }
  0x4d   :  { %v184_v5 = vpack.c.bf16 %v159_v4, %v158_v2  ;;  %v157_v7 = vld [vmem:[#allocation6 + $0x58] sm:$0xff]  ;;  %v154_v8 = vld [vmem:[#allocation6 + $0x40] sm:$0xff]  ;;  %v155_v10 = vld [vmem:[#allocation6 + $0x48] sm:$0xff] }
  0x4e   :  { %932 = vmatprep.subr.bf16.mxu0 %v185_v3  ;;  %v183_v9 = vpack.c.bf16 %v157_v7, %v156_v6  ;;  %v1119_v11 = vld [vmem:[#allocation3] sm:$0xff]   ;;  %v182_v12 = vpack.c.bf16 %v155_v10, %v154_v8  ;;  %v152_v13 = vld [vmem:[#allocation6 + $0x30] sm:$0xff]  ;;  %v153_v14 = vld [vmem:[#allocation6 + $0x38] sm:$0xff] }
  0x4f   :  { %933 = vmatpush3.bf16.msra.mxu0 %v185_v3  ;;  %948 = vmatprep.mubr.bf16.mxu0 %v1119_v11  ;;  %v181_v15 = vpack.c.bf16 %v153_v14, %v152_v13  ;;  %v397_v16 = vld [vmem:[#allocation11 + $0x78] sm:$0xff]  ;;  %v150_v17 = vld [vmem:[#allocation6 + $0x20] sm:$0xff]  ;;  %v151_v18 = vld [vmem:[#allocation6 + $0x28] sm:$0xff] }
  0x50   :  { %934 = vmatprep.subr.bf16.mxu0 %v184_v5  ;;  %964 = vmatprep.subr.mxu1 %v397_v16  ;;  %v396_v19 = vld [vmem:[#allocation11 + $0x70] sm:$0xff]  ;;  %v395_v20 = vld [vmem:[#allocation11 + $0x68] sm:$0xff]  ;;  %v180_v21 = vpack.c.bf16 %v151_v18, %v150_v17  ;;  %v394_v22 = vld [vmem:[#allocation11 + $0x60] sm:$0xff] }
  0x51   :  { %965 = vmatpush3.msra.mxu1 %v397_v16  ;;  %v148_v23 = vld [vmem:[#allocation6 + $0x10] sm:$0xff]  ;;  %v149_v24 = vld [vmem:[#allocation6 + $0x18] sm:$0xff]  ;;  %v146_v28 = vld [vmem:[#allocation6] sm:$0xff] }
  0x52   :  { %966 = vmatprep.subr.mxu1 %v396_v19  ;;  %v393_v25 = vld [vmem:[#allocation11 + $0x58] sm:$0xff]  ;;  %v179_v26 = vpack.c.bf16 %v149_v24, %v148_v23  ;;  %v392_v27 = vld [vmem:[#allocation11 + $0x50] sm:$0xff]  ;;  %v147_v29 = vld [vmem:[#allocation6 + $0x8] sm:$0xff] }
  0x53   :  { %935 = vmatpush3.bf16.msra.mxu0 %v184_v5  ;;  %967 = vmatpush3.msra.mxu1 %v396_v19  ;;  %v391_v30 = vld [vmem:[#allocation11 + $0x48] sm:$0xff]  ;;  %v178_v31 = vpack.c.bf16 %v147_v29, %v146_v28  ;;  %v390_v32 = vld [vmem:[#allocation11 + $0x40] sm:$0xff]  ;;  %v389_v33 = vld [vmem:[#allocation11 + $0x38] sm:$0xff] }
  0x54   :  { %936 = vmatprep.subr.bf16.mxu0 %v183_v9  ;;  %968 = vmatprep.subr.mxu1 %v395_v20  ;;  %v388_v34 = vld [vmem:[#allocation11 + $0x30] sm:$0xff]  ;;  %v1361_v35 = vld [vmem:[#allocation9 + $0x78] sm:$0xff]  ;;  %v1120_v36 = vld [vmem:[#allocation3 + $0x8] sm:$0xff]  }
  0x55   :  { %969 = vmatpush3.msra.mxu1 %v395_v20  ;;  %v387_v37 = vld [vmem:[#allocation11 + $0x28] sm:$0xff]  ;;  %v1121_v38 = vld [vmem:[#allocation3 + $0x10] sm:$0xff]   ;;  %v386_v40 = vld [vmem:[#allocation11 + $0x20] sm:$0xff] }
  0x56   :  { %970 = vmatprep.subr.mxu1 %v394_v22  ;;  %v1364_v39 = vld [vmem:[#allocation9 + $0x70] sm:$0xff]  ;;  %v1367_v41 = vld [vmem:[#allocation9 + $0x68] sm:$0xff]  ;;  %v385_v42 = vld [vmem:[#allocation11 + $0x18] sm:$0xff] }
  0x57   :  { %937 = vmatpush3.bf16.msra.mxu0 %v183_v9  ;;  %971 = vmatpush3.msra.mxu1 %v394_v22  ;;  %v1371_v43 = vld [vmem:[#allocation9 + $0x60] sm:$0xff]  ;;  %v1122_v44 = vld [vmem:[#allocation3 + $0x18] sm:$0xff]   ;;  %v1379_v47 = vld [vmem:[#allocation9 + $0x50] sm:$0xff] }
  0x58   :  { %938 = vmatprep.subr.bf16.mxu0 %v182_v12  ;;  %972 = vmatprep.subr.mxu1 %v393_v25  ;;  %v1123_v45 = vld [vmem:[#allocation3 + $0x20] sm:$0xff]   ;;  %v1375_v46 = vld [vmem:[#allocation9 + $0x58] sm:$0xff]  ;;  %v1383_v48 = vld [vmem:[#allocation9 + $0x48] sm:$0xff] }
  0x59   :  { %973 = vmatpush3.msra.mxu1 %v393_v25  ;;  %v1387_v49 = vld [vmem:[#allocation9 + $0x40] sm:$0xff]  ;;  %v1124_v50 = vld [vmem:[#allocation3 + $0x28] sm:$0xff]   ;;  %v1125_v51 = vld [vmem:[#allocation3 + $0x30] sm:$0xff]  }
  0x5a   :  { %974 = vmatprep.subr.mxu1 %v392_v27  ;;  %v1391_v52 = vld [vmem:[#allocation9 + $0x38] sm:$0xff]  ;;  %v1395_v53 = vld [vmem:[#allocation9 + $0x30] sm:$0xff]  ;;  %v1399_v54 = vld [vmem:[#allocation9 + $0x28] sm:$0xff] }
  0x5b   :  { %939 = vmatpush3.bf16.msra.mxu0 %v182_v12  ;;  %975 = vmatpush3.msra.mxu1 %v392_v27  ;;  %v1403_v55 = vld [vmem:[#allocation9 + $0x20] sm:$0xff]  ;;  %v1126_v56 = vld [vmem:[#allocation3 + $0x38] sm:$0xff]   ;;  %v384_v58 = vld [vmem:[#allocation11 + $0x10] sm:$0xff] }
  0x5c   :  { %940 = vmatprep.subr.bf16.mxu0 %v181_v15  ;;  %976 = vmatprep.subr.mxu1 %v391_v30  ;;  %v1407_v57 = vld [vmem:[#allocation9 + $0x18] sm:$0xff]  ;;  %v1413_v59 = vld [vmem:[#allocation9 + $0x10] sm:$0xff]  ;;  %v383_v60 = vld [vmem:[#allocation11 + $0x8] sm:$0xff] }
  0x5d   :  { %977 = vmatpush3.msra.mxu1 %v391_v30  ;;  %v1417_v61 = vld [vmem:[#allocation9 + $0x8] sm:$0xff]  ;;  %v382_v62 = vld [vmem:[#allocation11] sm:$0xff]  ;;  %v545_v2 = vld [vmem:[#allocation8 + $0x10] sm:$0xff] }
  0x5e   :  { %978 = vmatprep.subr.mxu1 %v390_v32  ;;  %v1421_v63 = vld [vmem:[#allocation9] sm:$0xff]  ;;  %v544_v1 = vld [vmem:[#allocation8 + $0x8] sm:$0xff]  ;;  %v546_v3 = vld [vmem:[#allocation8 + $0x18] sm:$0xff] }
  0x5f   :  { %941 = vmatpush3.bf16.msra.mxu0 %v181_v15  ;;  %979 = vmatpush3.msra.mxu1 %v390_v32  ;;  %v543_v0 = vld [vmem:[#allocation8] sm:$0xff]  ;;  %v548_v5 = vld [vmem:[#allocation8 + $0x28] sm:$0xff]  ;;  %v549_v6 = vld [vmem:[#allocation8 + $0x30] sm:$0xff] }
  0x60   :  { %942 = vmatprep.subr.bf16.mxu0 %v180_v21  ;;  %980 = vmatprep.subr.mxu1 %v389_v33  ;;  %v547_v4 = vld [vmem:[#allocation8 + $0x20] sm:$0xff]  ;;  %v550_v7 = vld [vmem:[#allocation8 + $0x38] sm:$0xff]  ;;  %v552_v25 = vld [vmem:[#allocation8 + $0x48] sm:$0xff] }
  0x61   :  { %981 = vmatpush3.msra.mxu1 %v389_v33  ;;  %v551_v24 = vld [vmem:[#allocation8 + $0x40] sm:$0xff]  ;;  %v554_v27 = vld [vmem:[#allocation8 + $0x58] sm:$0xff]  ;;  %v556_v29 = vld [vmem:[#allocation8 + $0x68] sm:$0xff] }
  0x62   :  { %982 = vmatprep.subr.mxu1 %v388_v34  ;;  %v555_v28 = vld [vmem:[#allocation8 + $0x60] sm:$0xff]  ;;  %v557_v30 = vld [vmem:[#allocation8 + $0x70] sm:$0xff] }
  0x63   :  { %943 = vmatpush3.bf16.msra.mxu0 %v180_v21  ;;  %983 = vmatpush3.msra.mxu1 %v388_v34 }
  0x64   :  { %944 = vmatprep.subr.bf16.mxu0 %v179_v26  ;;  %984 = vmatprep.subr.mxu1 %v387_v37 }
  0x65   :  { %985 = vmatpush3.msra.mxu1 %v387_v37  ;;  %v1460_v37 = vld [vmem:[%s1489_s5] ss:$0 sm:$0xff]  ;;  %s1287_s5 = smov [#allocation14]  }
  0x66   :  { %986 = vmatprep.subr.mxu1 %v386_v40  ;;  %s828_s10 = sshll.u32 %s1287_s5, 4  ;;  %s829_s10 = int_to_ptr.vmem [resolvable:$true] %s828_s10 }
  0x67   :  { %945 = vmatpush3.bf16.msra.mxu0 %v179_v26  ;;  %987 = vmatpush3.msra.mxu1 %v386_v40  ;;  %v553_v26 = vld [vmem:[#allocation8 + $0x50] sm:$0xff]  ;;  %v760_v40 = vld [vmem:[#allocation12 + $0x8] sm:$0xff]  ;;  %s1247_s11 = scalar_lea.vmem %s829_s10, 2048  ;;  %p1252_p3 = scmp.lt.s32.totalorder %s829_s10, %s829_s10 }
  0x68   :  { %946 = vmatprep.subr.bf16.mxu0 %v178_v31  ;;  %988 = vmatprep.subr.mxu1 %v385_v42  ;;  %vm776_vm0 = vcmp.lt.f32.partialorder %v760_v40, 1.0  ;;  %v767_v40 = vld [vmem:[#allocation12 + $0x40] sm:$0xff]  ;;  %p1248_p2 = scmp.ne.s32.totalorder %s829_s10, %s1247_s11  ;;  %p1253_p4 = scmp.lt.s32.totalorder %s1247_s11, %s1247_s11 }
  0x69   :  { %989 = vmatpush3.msra.mxu1 %v385_v42  ;;  %vm783_vm9 = vcmp.lt.f32.partialorder %v767_v40, 1.0 }
  0x6a   :  { %990 = vmatprep.subr.mxu1 %v384_v58  ;;  %p1254_p5 = por %p1253_p4, %p1252_p3 }
  0x6b   :  { %947 = vmatpush3.bf16.msra.mxu0 %v178_v31  ;;  %991 = vmatpush3.msra.mxu1 %v384_v58  ;;  %v558_v31 = vld [vmem:[#allocation8 + $0x78] sm:$0xff] }
  0x6c   :  { %1020 = vmatprep.subr.mxu0 %v1361_v35  ;;  %992 = vmatprep.subr.mxu1 %v383_v60  ;;  %p1255_p6 = pnand %p1254_p5, %p1248_p2 }
  0x6d   :  { %993 = vmatpush3.msra.mxu1 %v383_v60 }
  0x6e   :  { %949 = vmatmul.mubr.bf16.vlgmr.msra.gmra.mxu0 %v1120_v36  ;;  %994 = vmatprep.subr.mxu1 %v382_v62 }
  0x6f   :  { %952 = vmatprep.mubr.bf16.mxu0 %v1121_v38  ;;  %1021 = vmatpush3.msra.mxu0 %v1361_v35 }
  0x70   :  { %1022 = vmatprep.subr.mxu0 %v1364_v39  ;;  %995 = vmatpush3.msra.mxu1 %v382_v62 }
  0x71   :  { %1023 = vmatpush3.msra.mxu0 %v1364_v39  ;;  %1076 = vmatprep.subr.mxu1 %v1361_v35 }
  0x72   :  { %1024 = vmatprep.subr.mxu0 %v1367_v41 }
  0x73   :  { %1025 = vmatpush3.msra.mxu0 %v1367_v41 }
  0x74   :  { %1026 = vmatprep.subr.mxu0 %v1371_v43 }
  0x75   :  { %1027 = vmatpush3.msra.mxu0 %v1371_v43 }
  0x76   :  { %953 = vmatmul.mubr.bf16.gmra.mxu0 %v1122_v44  ;;  %1028 = vmatprep.subr.mxu0 %v1375_v46  ;;  %v759_v44 = vld [vmem:[#allocation12] sm:$0xff] }
  0x77   :  { %956 = vmatprep.mubr.bf16.mxu0 %v1123_v45  ;;  %1029 = vmatpush3.msra.mxu0 %v1375_v46  ;;  %vm775_vm1 = vcmp.lt.f32.partialorder %v759_v44, 1.0 }
  0x78   :  { %1030 = vmatprep.subr.mxu0 %v1379_v47 }
  0x79   :  { %1031 = vmatpush3.msra.mxu0 %v1379_v47 }
  0x7a   :  { %1032 = vmatprep.subr.mxu0 %v1383_v48 }
  0x7b   :  { %1033 = vmatpush3.msra.mxu0 %v1383_v48 }
  0x7c   :  { %1034 = vmatprep.subr.mxu0 %v1387_v49 }
  0x7d   :  { %1035 = vmatpush3.msra.mxu0 %v1387_v49 }
  0x7e   :  { %957 = vmatmul.mubr.bf16.gmra.mxu0 %v1124_v50  ;;  %1036 = vmatprep.subr.mxu0 %v1391_v52  ;;  %v762_v50 = vld [vmem:[#allocation12 + $0x18] sm:$0xff] }
  0x7f   :  { %960 = vmatprep.mubr.bf16.mxu0 %v1125_v51  ;;  %1037 = vmatpush3.msra.mxu0 %v1391_v52  ;;  %vm778_vm2 = vcmp.lt.f32.partialorder %v762_v50, 1.0 }
  0x80   :  { %1038 = vmatprep.subr.mxu0 %v1395_v53 }
  0x81   :  { %1039 = vmatpush3.msra.mxu0 %v1395_v53 }
  0x82   :  { %1040 = vmatprep.subr.mxu0 %v1399_v54 }
  0x83   :  { %1041 = vmatpush3.msra.mxu0 %v1399_v54 }
  0x84   :  { %1042 = vmatprep.subr.mxu0 %v1403_v55 }
  0x85   :  { %1043 = vmatpush3.msra.mxu0 %v1403_v55 }
  0x86   :  { %961 = vmatmul.mubr.bf16.gmra.mxu0 %v1126_v56  ;;  %1044 = vmatprep.subr.mxu0 %v1407_v57  ;;  %v761_v56 = vld [vmem:[#allocation12 + $0x10] sm:$0xff] }
  0x87   :  { %1045 = vmatpush3.msra.mxu0 %v1407_v57  ;;  %1052 = vmatprep.mubr.f32.mxu0 %v543_v0  ;;  %vm777_vm3 = vcmp.lt.f32.partialorder %v761_v56, 1.0 }
  0x88   :  { %1046 = vmatprep.subr.mxu0 %v1413_v59 }
  0x89   :  { %1047 = vmatpush3.msra.mxu0 %v1413_v59 }
  0x8a   :  { %1048 = vmatprep.subr.mxu0 %v1417_v61 }
  0x8b   :  { %1049 = vmatpush3.msra.mxu0 %v1417_v61 }
  0x8c   :  { %1050 = vmatprep.subr.mxu0 %v1421_v63 }
  0x8d   :  { %1051 = vmatpush3.msra.mxu0 %v1421_v63 }
  0x8e   :  { %1053 = vmatmul.mubr.f32.vlgmr.msra.gmra.mxu0 %v544_v1 }
  0x8f   :  { %1055 = vmatprep.mubr.f32.mxu0 %v545_v2 }
  0x92   :  { %1056 = vmatmul.mubr.f32.gmra.mxu0 %v546_v3 }
  0x93   :  { %1058 = vmatprep.mubr.f32.mxu0 %v547_v4 }
  0x96   :  { %1059 = vmatmul.mubr.f32.gmra.mxu0 %v548_v5  ;;  %v763_v5 = vld [vmem:[#allocation12 + $0x20] sm:$0xff] }
  0x97   :  { %1061 = vmatprep.mubr.f32.mxu0 %v549_v6  ;;  %vm779_vm5 = vcmp.lt.f32.partialorder %v763_v5, 1.0  ;;  %v774_v5 = vld [vmem:[#allocation12 + $0x78] sm:$0xff] }
  0x98   :  { %vm790_vm14 = vcmp.lt.f32.partialorder %v774_v5, 1.0 }
  0x9a   :  { %1062 = vmatmul.mubr.f32.gmra.mxu0 %v550_v7 }
 0x12e   :  { %v950_v8 = vpop.f32.mrf.mxu0 }
 0x130   :  { %v268_v9 = vpop.f32.mrf.mxu0 }
 0x131   :  { %996 = vmatprep.mubr.f32.mxu1 %v268_v9 }
 0x132   :  { %v951_v10 = vpop.f32.mrf.mxu0 }
 0x134   :  { %v271_v11 = vpop.f32.mrf.mxu0 }
 0x135   :  { %997 = vmatmul.mubr.f32.vlgmr.msra.gmra.mxu1 %v271_v11 }
 0x136   :  { %1092 = vmatpush3.msra.mxu1 %v1361_v35  ;;  %v954_v12 = vpop.f32.mrf.mxu0  ;;  %999 = vmatprep.mubr.f32.mxu1 %v950_v8 }
 0x137   :  { %1077 = vmatprep.subr.mxu1 %v1364_v39 }
 0x138   :  { %1093 = vmatpush3.msra.mxu1 %v1364_v39  ;;  %v284_v13 = vpop.f32.mrf.mxu0 }
 0x139   :  { %1078 = vmatprep.subr.mxu1 %v1367_v41  ;;  %1000 = vmatmul.mubr.f32.gmra.mxu1 %v951_v10 }
 0x13a   :  { %1094 = vmatpush3.msra.mxu1 %v1367_v41  ;;  %v955_v14 = vpop.f32.mrf.mxu0  ;;  %1002 = vmatprep.mubr.f32.mxu1 %v284_v13 }
 0x13b   :  { %1079 = vmatprep.subr.mxu1 %v1371_v43 }
 0x13c   :  { %1095 = vmatpush3.msra.mxu1 %v1371_v43  ;;  %v287_v15 = vpop.f32.mrf.mxu0 }
 0x13d   :  { %1080 = vmatprep.subr.mxu1 %v1375_v46  ;;  %1003 = vmatmul.mubr.f32.gmra.mxu1 %v287_v15 }
 0x13e   :  { %1096 = vmatpush3.msra.mxu1 %v1375_v46  ;;  %v958_v16 = vpop.f32.mrf.mxu0  ;;  %1005 = vmatprep.mubr.f32.mxu1 %v954_v12  ;;  %v766_v12 = vld [vmem:[#allocation12 + $0x38] sm:$0xff] }
 0x13f   :  { %1081 = vmatprep.subr.mxu1 %v1379_v47  ;;  %vm782_vm6 = vcmp.lt.f32.partialorder %v766_v12, 1.0 }
 0x140   :  { %1097 = vmatpush3.msra.mxu1 %v1379_v47  ;;  %v300_v17 = vpop.f32.mrf.mxu0 }
 0x141   :  { %1082 = vmatprep.subr.mxu1 %v1383_v48  ;;  %1006 = vmatmul.mubr.f32.gmra.mxu1 %v955_v14 }
 0x142   :  { %1098 = vmatpush3.msra.mxu1 %v1383_v48  ;;  %v959_v18 = vpop.f32.mrf.mxu0  ;;  %1008 = vmatprep.mubr.f32.mxu1 %v300_v17 }
 0x143   :  { %1083 = vmatprep.subr.mxu1 %v1387_v49 }
 0x144   :  { %1099 = vmatpush3.msra.mxu1 %v1387_v49  ;;  %v303_v19 = vpop.f32.mrf.mxu0 }
 0x145   :  { %1084 = vmatprep.subr.mxu1 %v1391_v52  ;;  %1009 = vmatmul.mubr.f32.gmra.mxu1 %v303_v19 }
 0x146   :  { %1100 = vmatpush3.msra.mxu1 %v1391_v52  ;;  %v962_v20 = vpop.f32.mrf.mxu0  ;;  %1011 = vmatprep.mubr.f32.mxu1 %v958_v16 }
 0x147   :  { %1085 = vmatprep.subr.mxu1 %v1395_v53 }
 0x148   :  { %1101 = vmatpush3.msra.mxu1 %v1395_v53  ;;  %v316_v21 = vpop.f32.mrf.mxu0 }
 0x149   :  { %1086 = vmatprep.subr.mxu1 %v1399_v54  ;;  %1012 = vmatmul.mubr.f32.gmra.mxu1 %v959_v18  ;;  %v765_v18 = vld [vmem:[#allocation12 + $0x30] sm:$0xff] }
 0x14a   :  { %1102 = vmatpush3.msra.mxu1 %v1399_v54  ;;  %v963_v22 = vpop.f32.mrf.mxu0  ;;  %1014 = vmatprep.mubr.f32.mxu1 %v316_v21  ;;  %vm781_vm7 = vcmp.lt.f32.partialorder %v765_v18, 1.0 }
 0x14b   :  { %1087 = vmatprep.subr.mxu1 %v1403_v55 }
 0x14c   :  { %1103 = vmatpush3.msra.mxu1 %v1403_v55  ;;  %v319_v23 = vpop.f32.mrf.mxu0 }
 0x14d   :  { %1088 = vmatprep.subr.mxu1 %v1407_v57  ;;  %1015 = vmatmul.mubr.f32.gmra.mxu1 %v319_v23 }
 0x14e   :  { %1104 = vmatpush3.msra.mxu1 %v1407_v57  ;;  %1017 = vmatprep.mubr.f32.mxu1 %v962_v20  ;;  %v1054_v32 = vpop.f32.mrf.mxu0 }
 0x14f   :  { %1089 = vmatprep.subr.mxu1 %v1413_v59 }
 0x150   :  { %1105 = vmatpush3.msra.mxu1 %v1413_v59  ;;  %v641_v33 = vpop.f32.mrf.mxu0 }
 0x151   :  { %1090 = vmatprep.subr.mxu1 %v1417_v61  ;;  %1018 = vmatmul.mubr.f32.gmra.mxu1 %v963_v22 }
 0x152   :  { %1106 = vmatpush3.msra.mxu1 %v1417_v61  ;;  %1064 = vmatprep.mubr.f32.mxu1 %v551_v24  ;;  %v1057_v34 = vpop.f32.mrf.mxu0 }
 0x153   :  { %1091 = vmatprep.subr.mxu1 %v1421_v63 }
 0x154   :  { %1107 = vmatpush3.msra.mxu1 %v1421_v63  ;;  %v651_v35 = vpop.f32.mrf.mxu0  ;;  %v764_v63 = vld [vmem:[#allocation12 + $0x28] sm:$0xff] }
 0x155   :  { %1065 = vmatmul.mubr.f32.vlgmr.msra.gmra.mxu1 %v552_v25  ;;  %vm780_vm4 = vcmp.lt.f32.partialorder %v764_v63, 1.0  ;;  %v771_v63 = vld [vmem:[#allocation12 + $0x60] sm:$0xff] }
 0x156   :  { %1067 = vmatprep.mubr.f32.mxu1 %v553_v26  ;;  %v1060_v38 = vpop.f32.mrf.mxu0  ;;  %vm787_vm13 = vcmp.lt.f32.partialorder %v771_v63, 1.0 }
 0x158   :  { %v661_v46 = vpop.f32.mrf.mxu0 }
 0x159   :  { %1068 = vmatmul.mubr.f32.gmra.mxu1 %v554_v27 }
 0x15a   :  { %1070 = vmatprep.mubr.f32.mxu1 %v555_v28  ;;  %v1063_v58 = vpop.f32.mrf.mxu0 }
 0x15c   :  { %v671_v7 = vpop.f32.mrf.mxu0 }
 0x15d   :  { %1071 = vmatmul.mubr.f32.gmra.mxu1 %v556_v29 }
 0x15e   :  { %1073 = vmatprep.mubr.f32.mxu1 %v557_v30 }
 0x161   :  { %1074 = vmatmul.mubr.f32.gmra.mxu1 %v558_v31 }
 0x1f5   :  { %v998_v36 = vpop.f32.mrf.mxu1 }
 0x1f6   :  { %v647_v39 = vadd.f32 %v1054_v32, %v998_v36 }
 0x1f7   :  { %v464_v41 = vpop.f32.mrf.mxu1 }
 0x1f8   :  { %v728_v42 = vadd.f32 %v1460_v37, %v647_v39  ;;  %v642_v43 = vadd.f32 %v641_v33, %v464_v41 }
 0x1f9   :  { %v1001_v45 = vpop.f32.mrf.mxu1 }
 0x1fa   :  { %v744_v47 = vmax.f32 %v728_v42, 0.0  ;;  %v727_v48 = vadd.f32 %v1460_v37, %v642_v43  ;;  %v657_v49 = vadd.f32 %v1057_v34, %v1001_v45  ;;  %v770_v45 = vld [vmem:[#allocation12 + $0x58] sm:$0xff] }
 0x1fb   :  { %v474_v51 = vpop.f32.mrf.mxu1  ;;  %vm786_vm10 = vcmp.lt.f32.partialorder %v770_v45, 1.0 }
 0x1fc   :  { %v792_v52 = vsel %vm776_vm0, %v744_v47, 0.0  ;;  %v743_v53 = vmax.f32 %v727_v48, 0.0  ;;  %v730_v54 = vadd.f32 %v1460_v37, %v657_v49  ;;  %v652_v55 = vadd.f32 %v651_v35, %v474_v51  ;;  %v768_v35 = vld [vmem:[#allocation12 + $0x48] sm:$0xff]  ;;  %v769_v51 = vld [vmem:[#allocation12 + $0x50] sm:$0xff] }
 0x1fd   :  { %808 = vst [vmem:[#allocation14 + $0x8] sm:$0xff] %v792_v52  ;;  %v1004_v57 = vpop.f32.mrf.mxu1  ;;  %vm784_vm8 = vcmp.lt.f32.partialorder %v768_v35, 1.0  ;;  %vm785_vm11 = vcmp.lt.f32.partialorder %v769_v51, 1.0 }
 0x1fe   :  { %v791_v59 = vsel %vm775_vm1, %v743_v53, 0.0  ;;  %v746_v60 = vmax.f32 %v730_v54, 0.0  ;;  %v729_v61 = vadd.f32 %v1460_v37, %v652_v55  ;;  %v667_v62 = vadd.f32 %v1060_v38, %v1004_v57  ;;  %v772_v57 = vld [vmem:[#allocation12 + $0x68] sm:$0xff] }
 0x1ff   :  { %807 = vst [vmem:[#allocation14] sm:$0xff] %v791_v59  ;;  %v484_v0 = vpop.f32.mrf.mxu1  ;;  %vm788_vm12 = vcmp.lt.f32.partialorder %v772_v57, 1.0 }
 0x200   :  { %v794_v1 = vsel %vm778_vm2, %v746_v60, 0.0  ;;  %v745_v2 = vmax.f32 %v729_v61, 0.0  ;;  %v732_v3 = vadd.f32 %v1460_v37, %v667_v62  ;;  %v662_v4 = vadd.f32 %v661_v46, %v484_v0 }
 0x201   :  { %810 = vst [vmem:[#allocation14 + $0x18] sm:$0xff] %v794_v1  ;;  %v1007_v6 = vpop.f32.mrf.mxu1 }
 0x202   :  { %v793_v8 = vsel %vm777_vm3, %v745_v2, 0.0  ;;  %v748_v9 = vmax.f32 %v732_v3, 0.0  ;;  %v731_v10 = vadd.f32 %v1460_v37, %v662_v4  ;;  %v677_v11 = vadd.f32 %v1063_v58, %v1007_v6 }
 0x203   :  { %809 = vst [vmem:[#allocation14 + $0x10] sm:$0xff] %v793_v8  ;;  %v494_v13 = vpop.f32.mrf.mxu1 }
 0x204   :  { %v796_v14 = vsel %vm780_vm4, %v748_v9, 0.0  ;;  %v747_v15 = vmax.f32 %v731_v10, 0.0  ;;  %v734_v16 = vadd.f32 %v1460_v37, %v677_v11  ;;  %v672_v17 = vadd.f32 %v671_v7, %v494_v13  ;;  %v773_v11 = vld [vmem:[#allocation12 + $0x70] sm:$0xff] }
 0x205   :  { %812 = vst [vmem:[#allocation14 + $0x28] sm:$0xff] %v796_v14  ;;  %v1010_v19 = vpop.f32.mrf.mxu1  ;;  %vm789_vm15 = vcmp.lt.f32.partialorder %v773_v11, 1.0 }
 0x206   :  { %v795_v20 = vsel %vm779_vm5, %v747_v15, 0.0  ;;  %v750_v21 = vmax.f32 %v734_v16, 0.0  ;;  %v733_v22 = vadd.f32 %v1460_v37, %v672_v17 }
 0x207   :  { %811 = vst [vmem:[#allocation14 + $0x20] sm:$0xff] %v795_v20  ;;  %v504_v23 = vpop.f32.mrf.mxu1 }
 0x208   :  { %v798_v24 = vsel %vm782_vm6, %v750_v21, 0.0  ;;  %v749_v25 = vmax.f32 %v733_v22, 0.0 }
 0x209   :  { %814 = vst [vmem:[#allocation14 + $0x38] sm:$0xff] %v798_v24  ;;  %v1013_v26 = vpop.f32.mrf.mxu1 }
 0x20a   :  { %v797_v27 = vsel %vm781_vm7, %v749_v25, 0.0 }
 0x20b   :  { %813 = vst [vmem:[#allocation14 + $0x30] sm:$0xff] %v797_v27  ;;  %v514_v28 = vpop.f32.mrf.mxu1 }
 0x20d   :  { %v1016_v29 = vpop.f32.mrf.mxu1 }
 0x20f   :  { %v524_v30 = vpop.f32.mrf.mxu1 }
 0x211   :  { %v1019_v31 = vpop.f32.mrf.mxu1 }
 0x213   :  { %v534_v32 = vpop.f32.mrf.mxu1 }
 0x215   :  { %v1066_v33 = vpop.f32.mrf.mxu1 }
 0x216   :  { %v687_v34 = vadd.f32 %v1066_v33, %v1010_v19 }
 0x217   :  { %v681_v36 = vpop.f32.mrf.mxu1 }
 0x218   :  { %v736_v38 = vadd.f32 %v1460_v37, %v687_v34  ;;  %v682_v39 = vadd.f32 %v681_v36, %v504_v23 }
 0x219   :  { %v1069_v41 = vpop.f32.mrf.mxu1 }
 0x21a   :  { %v752_v42 = vmax.f32 %v736_v38, 0.0  ;;  %v735_v43 = vadd.f32 %v1460_v37, %v682_v39  ;;  %v697_v44 = vadd.f32 %v1069_v41, %v1013_v26 }
 0x21b   :  { %v691_v46 = vpop.f32.mrf.mxu1 }
 0x21c   :  { %v800_v47 = vsel %vm784_vm8, %v752_v42, 0.0  ;;  %v751_v48 = vmax.f32 %v735_v43, 0.0  ;;  %v738_v49 = vadd.f32 %v1460_v37, %v697_v44  ;;  %v692_v50 = vadd.f32 %v691_v46, %v514_v28 }
 0x21d   :  { %816 = vst [vmem:[#allocation14 + $0x48] sm:$0xff] %v800_v47  ;;  %v1072_v52 = vpop.f32.mrf.mxu1 }
 0x21e   :  { %v799_v53 = vsel %vm783_vm9, %v751_v48, 0.0  ;;  %v754_v54 = vmax.f32 %v738_v49, 0.0  ;;  %v737_v55 = vadd.f32 %v1460_v37, %v692_v50  ;;  %v707_v56 = vadd.f32 %v1072_v52, %v1016_v29 }
 0x21f   :  { %815 = vst [vmem:[#allocation14 + $0x40] sm:$0xff] %v799_v53  ;;  %v701_v58 = vpop.f32.mrf.mxu1 }
 0x220   :  { %v802_v59 = vsel %vm786_vm10, %v754_v54, 0.0  ;;  %v753_v60 = vmax.f32 %v737_v55, 0.0  ;;  %v740_v61 = vadd.f32 %v1460_v37, %v707_v56  ;;  %v702_v62 = vadd.f32 %v701_v58, %v524_v30 }
 0x221   :  { %818 = vst [vmem:[#allocation14 + $0x58] sm:$0xff] %v802_v59  ;;  %v1075_v0 = vpop.f32.mrf.mxu1 }
 0x222   :  { %v801_v1 = vsel %vm785_vm11, %v753_v60, 0.0  ;;  %v756_v2 = vmax.f32 %v740_v61, 0.0  ;;  %v739_v3 = vadd.f32 %v1460_v37, %v702_v62  ;;  %v717_v4 = vadd.f32 %v1075_v0, %v1019_v31 }
 0x223   :  { %817 = vst [vmem:[#allocation14 + $0x50] sm:$0xff] %v801_v1  ;;  %v711_v6 = vpop.f32.mrf.mxu1 }
 0x224   :  { %v804_v7 = vsel %vm788_vm12, %v756_v2, 0.0  ;;  %v755_v8 = vmax.f32 %v739_v3, 0.0  ;;  %v742_v9 = vadd.f32 %v1460_v37, %v717_v4  ;;  %v712_v10 = vadd.f32 %v711_v6, %v534_v32 }
 0x225   :  { %820 = vst [vmem:[#allocation14 + $0x68] sm:$0xff] %v804_v7 }
 0x226   :  { %v803_v12 = vsel %vm787_vm13, %v755_v8, 0.0  ;;  %v758_v13 = vmax.f32 %v742_v9, 0.0  ;;  %v741_v14 = vadd.f32 %v1460_v37, %v712_v10 }
 0x227   :  { %819 = vst [vmem:[#allocation14 + $0x60] sm:$0xff] %v803_v12 }
 0x228   :  { %v806_v15 = vsel %vm790_vm14, %v758_v13, 0.0  ;;  %v757_v16 = vmax.f32 %v741_v14, 0.0 }
 0x229   :  { %822 = vst [vmem:[#allocation14 + $0x78] sm:$0xff] %v806_v15 }
 0x22a   :  { %v805_v17 = vsel %vm789_vm15, %v757_v16, 0.0 }
 0x22b   :  { %821 = vst [vmem:[#allocation14 + $0x70] sm:$0xff] %v805_v17 }
 0x22c   :  { %1258 = shalt.err (!%p1255_p6)
}
 0x22d   :  { %834 = dma.vmem_to_hbm [thread:$0]  %s829_s10, 2048, %s1491_s7, [#allocation5], %s1278_s27, %s1278_s27, %s1279_s28  }
 0x22e   :  { %1275 = dma.done.wait [#allocation5], 2048  }
 0x22f   :  { %1276 = vsyncadd [#allocation5], 4294965248 }
 0x230   :  { %838 = vsyncpa [#allocation4], 1 }
 0x231   :  { %839 = vsyncpa [#allocation7], 1 }
 0x232   :  { %840 = vsyncpa [#allocation10], 1 }
 0x233   :  { %841 = vsyncpa [#allocation13], 1 }
 0x234   :  { %842 = vsyncpa [#allocation5], 1 }

</bundles_post_ra>
